<compile_context>
chip_gen: v5e
topology: v5e:2x2
jax: 0.10.0
libtpu: 0.0.40
codegen_flags: <defaults>
</compile_context>

<pallas_src>
import jax
import jax.numpy as jnp
from jax import lax
from jax.experimental import pallas as pl
from jax.experimental.pallas import tpu as pltpu


def _round_up(x, m):
    return (x + m - 1) // m * m


def _lora_linear_kernel(x_ref, w_ref, r_ref, l_ref, b_ref, o_ref, acc_ref, t_ref):
    """One (tm, tn) output tile, reduced over the K grid axis.

    x_ref: (tm, tk)      input rows tile
    w_ref: (tn, tk)      frozen base weight tile (native (out, in) layout)
    r_ref: (r_pad, tk)   lora_right tile (rank padded to 128 lanes)
    l_ref: (tn, r_pad)   lora_left tile
    b_ref: (1, tn)       bias tile
    o_ref: (tm, tn)      output tile
    acc_ref: (tm, tn) f32     main GEMM accumulator (scratch)
    t_ref:   (tm, r_pad) f32  rank-r intermediate x @ R^T accumulator (scratch)
    """
    k = pl.program_id(2)

    @pl.when(k == 0)
    def _():
        acc_ref[...] = jnp.zeros_like(acc_ref)
        t_ref[...] = jnp.zeros_like(t_ref)

    x = x_ref[...]
    # Contract last dims of both operands -> MXU handles the "transpose" for free.
    contract_last = (((1,), (1,)), ((), ()))

    # acc += x_tile @ W_tile^T
    acc_ref[...] += lax.dot_general(
        x, w_ref[...], dimension_numbers=contract_last,
        preferred_element_type=jnp.float32)

    # t += x_tile @ R_tile^T   (tiny rank-r partial, accumulated over K)
    t_ref[...] += lax.dot_general(
        x, r_ref[...], dimension_numbers=contract_last,
        preferred_element_type=jnp.float32)

    @pl.when(k == pl.num_programs(2) - 1)
    def _():
        # lora = (x @ R^T) @ L^T  -- done once per (i, j) tile, not per K step.
        lora = lax.dot_general(
            t_ref[...], l_ref[...], dimension_numbers=contract_last,
            preferred_element_type=jnp.float32)
        o_ref[...] = (acc_ref[...] + lora + b_ref[...]).astype(o_ref.dtype)


def lora_linear(x, weight, bias, lora_left, lora_right, *, tm=256, tn=256, tk=512):
    """Flatten leading dims, pad to TPU-friendly tiles, run the kernel, un-pad."""
    in_features = x.shape[-1]
    out_features = weight.shape[0]
    lora_dim = lora_right.shape[0]

    x_flat = x.reshape(-1, in_features)
    m = x_flat.shape[0]

    # --- choose padded sizes / tile sizes (lane dims multiple of 128) ---
    m_pad = _round_up(m, 8)
    tm = min(tm, m_pad)
    m_pad = _round_up(m_pad, tm)

    n_pad = _round_up(out_features, 128)
    tn = min(tn, n_pad)
    n_pad = _round_up(n_pad, tn)

    k_pad = _round_up(in_features, 128)
    tk = min(tk, k_pad)
    k_pad = _round_up(k_pad, tk)

    r_pad = _round_up(lora_dim, 128)

    # --- zero-pad operands (zero padding keeps the math exact; padded rows/cols
    #     contribute nothing and padded output is sliced off below) ---
    xp = jnp.pad(x_flat, ((0, m_pad - m), (0, k_pad - in_features)))
    wp = jnp.pad(weight, ((0, n_pad - out_features), (0, k_pad - in_features)))
    bp = jnp.pad(bias, (0, n_pad - out_features)).reshape(1, n_pad)
    lp = jnp.pad(lora_left, ((0, n_pad - out_features), (0, r_pad - lora_dim)))
    rp = jnp.pad(lora_right, ((0, r_pad - lora_dim), (0, k_pad - in_features)))

    grid = (m_pad // tm, n_pad // tn, k_pad // tk)

    itemsize = jnp.dtype(x.dtype).itemsize
    cost = pl.CostEstimate(
        flops=2 * m_pad * n_pad * k_pad
        + 2 * m_pad * r_pad * k_pad * (n_pad // tn)
        + 2 * m_pad * r_pad * n_pad,
        transcendentals=0,
        bytes_accessed=(xp.size + wp.size + rp.size + lp.size + bp.size) * itemsize
        + m_pad * n_pad * itemsize,
    )

    out_pad = pl.pallas_call(
        _lora_linear_kernel,
        out_shape=jax.ShapeDtypeStruct((m_pad, n_pad), x.dtype),
        grid_spec=pltpu.PrefetchScalarGridSpec(
            num_scalar_prefetch=0,
            grid=grid,
            in_specs=[
                pl.BlockSpec((tm, tk), lambda i, j, k: (i, k)),       # x
                pl.BlockSpec((tn, tk), lambda i, j, k: (j, k)),       # weight
                pl.BlockSpec((r_pad, tk), lambda i, j, k: (0, k)),    # lora_right
                pl.BlockSpec((tn, r_pad), lambda i, j, k: (j, 0)),    # lora_left
                pl.BlockSpec((1, tn), lambda i, j, k: (0, j)),        # bias
            ],
            out_specs=pl.BlockSpec((tm, tn), lambda i, j, k: (i, j)),
            scratch_shapes=[
                pltpu.VMEM((tm, tn), jnp.float32),     # GEMM accumulator
                pltpu.VMEM((tm, r_pad), jnp.float32),  # rank-r intermediate
            ],
        ),
        compiler_params=pltpu.CompilerParams(
            dimension_semantics=("parallel", "parallel", "arbitrary"),
            vmem_limit_bytes=64 * 1024 * 1024,
        ),
        cost_estimate=cost,
    )(xp, wp, rp, lp, bp)

    out_flat = out_pad[:m, :out_features]
    return out_flat.reshape(x.shape[:-1] + (out_features,))


if __name__ == "__main__":
    # Small deterministic problem: batch=2, seq=8, hidden(in)=32, out=32, lora_dim=8
    batch, seq, in_features, out_features, lora_dim = 2, 8, 32, 32, 8
    lora_scaling = 1.0  # defined by the module but unused in forward (kept for parity)

    key = jax.random.PRNGKey(0)
    k_w, k_b, k_r, k_x = jax.random.split(key, 4)

    weight = jax.random.normal(k_w, (out_features, in_features), dtype=jnp.float32)
    bias = jax.random.normal(k_b, (out_features,), dtype=jnp.float32)
    # init_parameters(): lora_left zeros, lora_right ~ normal
    lora_right = jax.random.normal(k_r, (lora_dim, in_features), dtype=jnp.float32)
    lora_left = jnp.zeros((out_features, lora_dim), dtype=jnp.float32)
    # make lora_left nonzero so the LoRA path is actually exercised numerically
    lora_left = lora_left + 0.01 * jax.random.normal(
        jax.random.PRNGKey(1), (out_features, lora_dim), dtype=jnp.float32
    )

    x = jax.random.normal(k_x, (batch, seq, in_features), dtype=jnp.float32)

    out = lora_linear(x, weight, bias, lora_left, lora_right)
    out = jax.block_until_ready(out)

    # Reference check (pure JAX).  Note: the kernel computes
    # x@W^T + (x@R^T)@L^T which differs from the reference only in f32
    # summation order; tolerance reflects that.
    w_after = weight + lora_left @ lora_right
    ref = (x.reshape(-1, in_features) @ w_after.T + bias).reshape(
        batch, seq, out_features
    )
    assert out.shape == (batch, seq, out_features)
    assert jnp.allclose(out, ref, atol=1e-4, rtol=1e-4), (
        float(jnp.max(jnp.abs(out - ref)))
    )

    print("KERNEL_OK")
</pallas_src>

<mosaic_0001>
module attributes {stable_mosaic.version = 11 : i64} {
  func.func @_lora_linear_kernel(%arg0: i32, %arg1: i32, %arg2: i32, %arg3: memref<16x128xf32, #tpu.memory_space<vmem>>, %arg4: memref<128x128xf32, #tpu.memory_space<vmem>>, %arg5: memref<128x128xf32, #tpu.memory_space<vmem>>, %arg6: memref<128x128xf32, #tpu.memory_space<vmem>>, %arg7: memref<1x128xf32, #tpu.memory_space<vmem>>, %arg8: memref<16x128xf32, #tpu.memory_space<vmem>>, %arg9: memref<16x128xf32, #tpu.memory_space<vmem>>, %arg10: memref<16x128xf32, #tpu.memory_space<vmem>>) attributes {dimension_semantics = [#tpu.dimension_semantics<parallel>, #tpu.dimension_semantics<parallel>, #tpu.dimension_semantics<arbitrary>], iteration_bounds = array<i64: 1, 1, 1>, scalar_prefetch = 0 : i64, scratch_operands = 2 : i64, tpu.core_type = #tpu.core_type<tc>, window_params = [{transform_indices = @transform_0, window_bounds = array<i64: 16, 128>}, {transform_indices = @transform_1, window_bounds = array<i64: 128, 128>}, {transform_indices = @transform_2, window_bounds = array<i64: 128, 128>}, {transform_indices = @transform_3, window_bounds = array<i64: 128, 128>}, {transform_indices = @transform_4, window_bounds = array<i64: 1, 128>}, {transform_indices = @transform_5, window_bounds = array<i64: 16, 128>}]} {
    %c0_i32 = arith.constant 0 : i32
    %0 = arith.cmpi eq, %arg2, %c0_i32 : i32
    %1 = arith.extui %0 : i1 to i32
    %c0_i32_0 = arith.constant 0 : i32
    %2 = arith.cmpi ne, %1, %c0_i32_0 : i32
    scf.if %2 {
      %cst_17 = arith.constant 0.000000e+00 : f32
      %17 = vector.broadcast %cst_17 : f32 to vector<16x128xf32>
      %c0_18 = arith.constant 0 : index
      %c0_19 = arith.constant 0 : index
      %18 = vector.load %arg9[%c0_18, %c0_19] : memref<16x128xf32, #tpu.memory_space<vmem>>, vector<16x128xf32>
      tpu.vector_store %arg9[%c0_18, %c0_19], %17 {strides = array<i32>} : memref<16x128xf32, #tpu.memory_space<vmem>>, vector<16x128xf32>,
      %cst_20 = arith.constant 0.000000e+00 : f32
      %19 = vector.broadcast %cst_20 : f32 to vector<16x128xf32>
      %c0_21 = arith.constant 0 : index
      %c0_22 = arith.constant 0 : index
      %20 = vector.load %arg10[%c0_21, %c0_22] : memref<16x128xf32, #tpu.memory_space<vmem>>, vector<16x128xf32>
      tpu.vector_store %arg10[%c0_21, %c0_22], %19 {strides = array<i32>} : memref<16x128xf32, #tpu.memory_space<vmem>>, vector<16x128xf32>,
    } else {
    }
    %c0 = arith.constant 0 : index
    %c0_1 = arith.constant 0 : index
    %3 = vector.load %arg3[%c0, %c0_1] : memref<16x128xf32, #tpu.memory_space<vmem>>, vector<16x128xf32>
    %c0_2 = arith.constant 0 : index
    %c0_3 = arith.constant 0 : index
    %4 = vector.load %arg9[%c0_2, %c0_3] : memref<16x128xf32, #tpu.memory_space<vmem>>, vector<16x128xf32>
    %c0_4 = arith.constant 0 : index
    %c0_5 = arith.constant 0 : index
    %5 = vector.load %arg4[%c0_4, %c0_5] : memref<128x128xf32, #tpu.memory_space<vmem>>, vector<128x128xf32>
    %cst = arith.constant dense<0.000000e+00> : vector<16x128xf32>
    %6 = tpu.matmul %3, %5, %cst {dimension_numbers = #tpu.dot_dimension_numbers<[1], [1], [0], [0], [0, 0, 1, 0], [], []>} : vector<16x128xf32>, vector<128x128xf32>, vector<16x128xf32> -> vector<16x128xf32>
    %7 = arith.addf %4, %6 : vector<16x128xf32>
    %c0_6 = arith.constant 0 : index
    %c0_7 = arith.constant 0 : index
    %8 = vector.load %arg9[%c0_6, %c0_7] : memref<16x128xf32, #tpu.memory_space<vmem>>, vector<16x128xf32>
    tpu.vector_store %arg9[%c0_6, %c0_7], %7 {strides = array<i32>} : memref<16x128xf32, #tpu.memory_space<vmem>>, vector<16x128xf32>,
    %c0_8 = arith.constant 0 : index
    %c0_9 = arith.constant 0 : index
    %9 = vector.load %arg10[%c0_8, %c0_9] : memref<16x128xf32, #tpu.memory_space<vmem>>, vector<16x128xf32>
    %c0_10 = arith.constant 0 : index
    %c0_11 = arith.constant 0 : index
    %10 = vector.load %arg5[%c0_10, %c0_11] : memref<128x128xf32, #tpu.memory_space<vmem>>, vector<128x128xf32>
    %cst_12 = arith.constant dense<0.000000e+00> : vector<16x128xf32>
    %11 = tpu.matmul %3, %10, %cst_12 {dimension_numbers = #tpu.dot_dimension_numbers<[1], [1], [0], [0], [0, 0, 1, 0], [], []>} : vector<16x128xf32>, vector<128x128xf32>, vector<16x128xf32> -> vector<16x128xf32>
    %12 = arith.addf %9, %11 : vector<16x128xf32>
    %c0_13 = arith.constant 0 : index
    %c0_14 = arith.constant 0 : index
    %13 = vector.load %arg10[%c0_13, %c0_14] : memref<16x128xf32, #tpu.memory_space<vmem>>, vector<16x128xf32>
    tpu.vector_store %arg10[%c0_13, %c0_14], %12 {strides = array<i32>} : memref<16x128xf32, #tpu.memory_space<vmem>>, vector<16x128xf32>,
    %c0_i32_15 = arith.constant 0 : i32
    %14 = arith.cmpi eq, %arg2, %c0_i32_15 : i32
    %15 = arith.extui %14 : i1 to i32
    %c0_i32_16 = arith.constant 0 : i32
    %16 = arith.cmpi ne, %15, %c0_i32_16 : i32
    scf.if %16 {
      %c0_17 = arith.constant 0 : index
      %c0_18 = arith.constant 0 : index
      %17 = vector.load %arg10[%c0_17, %c0_18] : memref<16x128xf32, #tpu.memory_space<vmem>>, vector<16x128xf32>
      %c0_19 = arith.constant 0 : index
      %c0_20 = arith.constant 0 : index
      %18 = vector.load %arg6[%c0_19, %c0_20] : memref<128x128xf32, #tpu.memory_space<vmem>>, vector<128x128xf32>
      %cst_21 = arith.constant dense<0.000000e+00> : vector<16x128xf32>
      %19 = tpu.matmul %17, %18, %cst_21 {dimension_numbers = #tpu.dot_dimension_numbers<[1], [1], [0], [0], [0, 0, 1, 0], [], []>} : vector<16x128xf32>, vector<128x128xf32>, vector<16x128xf32> -> vector<16x128xf32>
      %c0_22 = arith.constant 0 : index
      %c0_23 = arith.constant 0 : index
      %20 = vector.load %arg9[%c0_22, %c0_23] : memref<16x128xf32, #tpu.memory_space<vmem>>, vector<16x128xf32>
      %21 = arith.addf %20, %19 : vector<16x128xf32>
      %c0_24 = arith.constant 0 : index
      %c0_25 = arith.constant 0 : index
      %22 = vector.load %arg7[%c0_24, %c0_25] : memref<1x128xf32, #tpu.memory_space<vmem>>, vector<1x128xf32>
      %23 = vector.broadcast %22 : vector<1x128xf32> to vector<16x128xf32>
      %24 = arith.addf %21, %23 : vector<16x128xf32>
      %c0_26 = arith.constant 0 : index
      %c0_27 = arith.constant 0 : index
      %25 = vector.load %arg8[%c0_26, %c0_27] : memref<16x128xf32, #tpu.memory_space<vmem>>, vector<16x128xf32>
      tpu.vector_store %arg8[%c0_26, %c0_27], %24 {strides = array<i32>} : memref<16x128xf32, #tpu.memory_space<vmem>>, vector<16x128xf32>,
    } else {
    }
    return
  }
  func.func @transform_0(%arg0: i32, %arg1: i32, %arg2: i32) -> (i32, i32) {
    %c0_i32 = arith.constant 0 : i32
    return %arg0, %arg2 : i32, i32
  }
  func.func @transform_1(%arg0: i32, %arg1: i32, %arg2: i32) -> (i32, i32) {
    %c0_i32 = arith.constant 0 : i32
    return %arg1, %arg2 : i32, i32
  }
  func.func @transform_2(%arg0: i32, %arg1: i32, %arg2: i32) -> (i32, i32) {
    %c0_i32 = arith.constant 0 : i32
    %c0_i32_0 = arith.constant 0 : i32
    return %c0_i32, %arg2 : i32, i32
  }
  func.func @transform_3(%arg0: i32, %arg1: i32, %arg2: i32) -> (i32, i32) {
    %c0_i32 = arith.constant 0 : i32
    %c0_i32_0 = arith.constant 0 : i32
    return %arg1, %c0_i32 : i32, i32
  }
  func.func @transform_4(%arg0: i32, %arg1: i32, %arg2: i32) -> (i32, i32) {
    %c0_i32 = arith.constant 0 : i32
    %c0_i32_0 = arith.constant 0 : i32
    return %c0_i32, %arg1 : i32, i32
  }
  func.func @transform_5(%arg0: i32, %arg1: i32, %arg2: i32) -> (i32, i32) {
    %c0_i32 = arith.constant 0 : i32
    return %arg0, %arg1 : i32, i32
  }
}

</mosaic_0001>

<bundles_post_ra>
// kernel: tpu_custom_call.1
= control target key start
LH: loop header
LB: loop body
LE: loop exit
PB: predicated region body
PF: predicated region fallthrough
CT: control target
= control target key end

     0   :  { %10 = vsyncpa [#allocation5], 0  ;;  %s483_s0 = inlined_call_operand.hbm [shape: f32[16,128], index: 0, kind: input, shape index: {}]   ;;  %s484_s1 = inlined_call_operand.hbm [shape: f32[128,128], index: 1, kind: input, shape index: {}]   ;;  %s485_s2 = inlined_call_operand.hbm [shape: f32[128,128], index: 2, kind: input, shape index: {}]   ;;  %s486_s3 = inlined_call_operand.hbm [shape: f32[128,128], index: 3, kind: input, shape index: {}]   ;;  %s487_s4 = inlined_call_operand.vmem [shape: f32[1,128], index: 4, kind: input, shape index: {}]   ;;  %s488_s5 = inlined_call_operand.hbm [shape: f32[16,128], index: 5, kind: output, shape index: {}]  }
   0x1   :  { %11 = vsyncpa [#allocation8], 0 }
   0x2   :  { %12 = vsyncpa [#allocation11], 0 }
   0x3   :  { %13 = vsyncpa [#allocation6], 0  ;;  %s31_s20 = sshll.u32 %s484_s1, 4  ;;  %s413_s21 = smov [#allocation7]   ;;  %s32_s20 = int_to_ptr.hbm [resolvable:$true] %s31_s20 }
   0x4   :  { %s33_s22 = sshll.u32 %s413_s21, 4  ;;  %s18_s25 = sshll.u32 %s483_s0, 4  ;;  %s34_s22 = int_to_ptr.vmem [resolvable:$true] %s33_s22  ;;  %s19_s25 = int_to_ptr.hbm [resolvable:$true] %s18_s25 }
   0x5   :  { %s414_s26 = smov 128   ;;  %s415_s27 = smov 8  }
   0x6   :  { %39 = dma.hbm_to_vmem [thread:$0]  %s32_s20, 2048, %s34_s22, [#allocation8], %s414_s26, %s414_s26, %s415_s27  }
   0x7   :  { %s416_s28 = smov [#allocation4]   ;;  %s44_s1 = sshll.u32 %s485_s2, 4  ;;  %s45_s1 = int_to_ptr.hbm [resolvable:$true] %s44_s1 }
   0x8   :  { %s20_s29 = sshll.u32 %s416_s28, 4  ;;  %s57_s8 = sshll.u32 %s486_s3, 4  ;;  %s21_s29 = int_to_ptr.vmem [resolvable:$true] %s20_s29  ;;  %s58_s8 = int_to_ptr.hbm [resolvable:$true] %s57_s8 }
   0x9   :  { %26 = dma.hbm_to_vmem [thread:$0]  %s19_s25, 256, %s21_s29, [#allocation5], %s414_s26, %s414_s26, %s415_s27  }
   0xa   :  { %s417_s9 = smov [#allocation9]   ;;  %s418_s11 = smov [#allocation10]  }
   0xb   :  { %s46_s10 = sshll.u32 %s417_s9, 4  ;;  %s59_s2 = sshll.u32 %s418_s11, 4  ;;  %s47_s10 = int_to_ptr.vmem [resolvable:$true] %s46_s10  ;;  %s60_s2 = int_to_ptr.vmem [resolvable:$true] %s59_s2 }
   0xc   :  { %52 = dma.hbm_to_vmem [thread:$0]  %s45_s1, 2048, %s47_s10, [#allocation8], %s414_s26, %s414_s26, %s415_s27  }
   0xd   :  { %65 = dma.hbm_to_vmem [thread:$0]  %s58_s8, 2048, %s60_s2, [#allocation11], %s414_s26, %s414_s26, %s415_s27  }
   0xe   :  { %405 = dma.done.wait [#allocation5], 256  }
   0xf   :  { %406 = vsyncadd [#allocation5], 4294967040 }
  0x10   :  { %407 = dma.done.wait [#allocation8], 4096  }
  0x11   :  { %408 = vsyncadd [#allocation8], 4294963200 }
  0x12   :  { %409 = dma.done.wait [#allocation11], 2048  }
  0x13   :  { %410 = vsyncadd [#allocation11], 4294965248  ;;  %v156_v0 = vld [vmem:[#allocation9 + $0x78] sm:$0xff]  ;;  %v155_v1 = vld [vmem:[#allocation9 + $0x70] sm:$0xff]  ;;  %s419_s13 = smov [#allocation12]   ;;  %s246_s17 = sshll.u32 %s488_s5, 4  ;;  %s247_s17 = int_to_ptr.hbm [resolvable:$true] %s246_s17 }
  0x14   :  { %157 = vmatpush.xpose.msra.mxu1 %v156_v0  ;;  %v154_v2 = vld [vmem:[#allocation9 + $0x68] sm:$0xff]  ;;  %v153_v3 = vld [vmem:[#allocation9 + $0x60] sm:$0xff]  ;;  %v152_v4 = vld [vmem:[#allocation9 + $0x58] sm:$0xff]  ;;  %s244_s14 = sshll.u32 %s419_s13, 4  ;;  %s245_s14 = int_to_ptr.vmem [resolvable:$true] %s244_s14 }
  0x15   :  { %v151_v5 = vld [vmem:[#allocation9 + $0x50] sm:$0xff]  ;;  %v150_v6 = vld [vmem:[#allocation9 + $0x48] sm:$0xff]  ;;  %v149_v7 = vld [vmem:[#allocation9 + $0x40] sm:$0xff] }
  0x16   :  { %v148_v8 = vld [vmem:[#allocation9 + $0x38] sm:$0xff]  ;;  %v147_v9 = vld [vmem:[#allocation9 + $0x30] sm:$0xff]  ;;  %v146_v10 = vld [vmem:[#allocation9 + $0x28] sm:$0xff] }
  0x17   :  { %v204_v11 = vld [vmem:[#allocation10 + $0x78] sm:$0xff]  ;;  %v145_v13 = vld [vmem:[#allocation9 + $0x20] sm:$0xff]  ;;  %v203_v14 = vld [vmem:[#allocation10 + $0x70] sm:$0xff] }
  0x18   :  { %158 = vmatpush.xpose.msra.mxu1 %v155_v1  ;;  %v111_v12 = vld [vmem:[#allocation7 + $0x78] sm:$0xff]  ;;  %205 = vmatpush.xpose.msra.mxu2 %v204_v11  ;;  %v110_v15 = vld [vmem:[#allocation7 + $0x70] sm:$0xff]  ;;  %v202_v17 = vld [vmem:[#allocation10 + $0x68] sm:$0xff] }
  0x19   :  { %112 = vmatpush.xpose.msra.mxu0 %v111_v12  ;;  %261 = vmatpush.xpose.msra.mxu3 %v111_v12  ;;  %v144_v16 = vld [vmem:[#allocation9 + $0x18] sm:$0xff]  ;;  %v109_v18 = vld [vmem:[#allocation7 + $0x68] sm:$0xff]  ;;  %v143_v19 = vld [vmem:[#allocation9 + $0x10] sm:$0xff] }
  0x1a   :  { %v201_v20 = vld [vmem:[#allocation10 + $0x60] sm:$0xff]  ;;  %v142_v22 = vld [vmem:[#allocation9 + $0x8] sm:$0xff]  ;;  %v200_v23 = vld [vmem:[#allocation10 + $0x58] sm:$0xff] }
  0x1b   :  { %v108_v21 = vld [vmem:[#allocation7 + $0x60] sm:$0xff]  ;;  %v107_v24 = vld [vmem:[#allocation7 + $0x58] sm:$0xff]  ;;  %v199_v26 = vld [vmem:[#allocation10 + $0x50] sm:$0xff] }
  0x1c   :  { %159 = vmatpush.xpose.msra.mxu1 %v154_v2  ;;  %206 = vmatpush.xpose.msra.mxu2 %v203_v14  ;;  %v141_v25 = vld [vmem:[#allocation9] sm:$0xff]  ;;  %v106_v27 = vld [vmem:[#allocation7 + $0x50] sm:$0xff]  ;;  %v198_v29 = vld [vmem:[#allocation10 + $0x48] sm:$0xff] }
  0x1d   :  { %113 = vmatpush.xpose.msra.mxu0 %v110_v15  ;;  %262 = vmatpush.xpose.msra.mxu3 %v110_v15  ;;  %v92_v28 = vld [vmem:[#allocation4] sm:$0xff]  ;;  %v105_v30 = vld [vmem:[#allocation7 + $0x48] sm:$0xff]  ;;  %v197_v31 = vld [vmem:[#allocation10 + $0x40] sm:$0xff] }
  0x1e   :  { %v104_v32 = vld [vmem:[#allocation7 + $0x40] sm:$0xff]  ;;  %v93_v33 = vld [vmem:[#allocation4 + $0x8] sm:$0xff]  ;;  %v195_v36 = vld [vmem:[#allocation10 + $0x30] sm:$0xff] }
  0x1f   :  { %v196_v34 = vld [vmem:[#allocation10 + $0x38] sm:$0xff]  ;;  %v102_v37 = vld [vmem:[#allocation7 + $0x30] sm:$0xff]  ;;  %v194_v38 = vld [vmem:[#allocation10 + $0x28] sm:$0xff] }
  0x20   :  { %160 = vmatpush.xpose.msra.mxu1 %v153_v3  ;;  %207 = vmatpush.xpose.msra.mxu2 %v202_v17  ;;  %v103_v35 = vld [vmem:[#allocation7 + $0x38] sm:$0xff]  ;;  %v101_v39 = vld [vmem:[#allocation7 + $0x28] sm:$0xff]  ;;  %v193_v40 = vld [vmem:[#allocation10 + $0x20] sm:$0xff] }
  0x21   :  { %114 = vmatpush.xpose.msra.mxu0 %v109_v18  ;;  %263 = vmatpush.xpose.msra.mxu3 %v109_v18  ;;  %v100_v41 = vld [vmem:[#allocation7 + $0x20] sm:$0xff]  ;;  %v192_v42 = vld [vmem:[#allocation10 + $0x18] sm:$0xff]  ;;  %v191_v44 = vld [vmem:[#allocation10 + $0x10] sm:$0xff] }
  0x22   :  { %v99_v43 = vld [vmem:[#allocation7 + $0x18] sm:$0xff]  ;;  %v98_v45 = vld [vmem:[#allocation7 + $0x10] sm:$0xff]  ;;  %v190_v46 = vld [vmem:[#allocation10 + $0x8] sm:$0xff] }
  0x23   :  { %v97_v47 = vld [vmem:[#allocation7 + $0x8] sm:$0xff]  ;;  %v189_v48 = vld [vmem:[#allocation10] sm:$0xff]  ;;  %v284_v53 = vld [vmem:[%s487_s4] ss:$0 sm:$0xff] }
  0x24   :  { %161 = vmatpush.xpose.msra.mxu1 %v152_v4  ;;  %208 = vmatpush.xpose.msra.mxu2 %v201_v20  ;;  %v96_v49 = vld [vmem:[#allocation7] sm:$0xff] }
  0x25   :  { %115 = vmatpush.xpose.msra.mxu0 %v108_v21  ;;  %264 = vmatpush.xpose.msra.mxu3 %v108_v21 }
  0x28   :  { %162 = vmatpush.xpose.msra.mxu1 %v151_v5  ;;  %209 = vmatpush.xpose.msra.mxu2 %v200_v23 }
  0x29   :  { %116 = vmatpush.xpose.msra.mxu0 %v107_v24  ;;  %265 = vmatpush.xpose.msra.mxu3 %v107_v24 }
  0x2c   :  { %163 = vmatpush.xpose.msra.mxu1 %v150_v6  ;;  %210 = vmatpush.xpose.msra.mxu2 %v199_v26 }
  0x2d   :  { %117 = vmatpush.xpose.msra.mxu0 %v106_v27  ;;  %266 = vmatpush.xpose.msra.mxu3 %v106_v27 }
  0x30   :  { %164 = vmatpush.xpose.msra.mxu1 %v149_v7  ;;  %211 = vmatpush.xpose.msra.mxu2 %v198_v29 }
  0x31   :  { %118 = vmatpush.xpose.msra.mxu0 %v105_v30  ;;  %267 = vmatpush.xpose.msra.mxu3 %v105_v30 }
  0x34   :  { %165 = vmatpush.xpose.msra.mxu1 %v148_v8  ;;  %212 = vmatpush.xpose.msra.mxu2 %v197_v31 }
  0x35   :  { %119 = vmatpush.xpose.msra.mxu0 %v104_v32  ;;  %268 = vmatpush.xpose.msra.mxu3 %v104_v32 }
  0x38   :  { %166 = vmatpush.xpose.msra.mxu1 %v147_v9  ;;  %213 = vmatpush.xpose.msra.mxu2 %v196_v34 }
  0x39   :  { %120 = vmatpush.xpose.msra.mxu0 %v103_v35  ;;  %269 = vmatpush.xpose.msra.mxu3 %v103_v35 }
  0x3c   :  { %167 = vmatpush.xpose.msra.mxu1 %v146_v10  ;;  %214 = vmatpush.xpose.msra.mxu2 %v195_v36 }
  0x3d   :  { %121 = vmatpush.xpose.msra.mxu0 %v102_v37  ;;  %270 = vmatpush.xpose.msra.mxu3 %v102_v37 }
  0x40   :  { %168 = vmatpush.xpose.msra.mxu1 %v145_v13  ;;  %215 = vmatpush.xpose.msra.mxu2 %v194_v38 }
  0x41   :  { %122 = vmatpush.xpose.msra.mxu0 %v101_v39  ;;  %271 = vmatpush.xpose.msra.mxu3 %v101_v39 }
  0x44   :  { %169 = vmatpush.xpose.msra.mxu1 %v144_v16  ;;  %216 = vmatpush.xpose.msra.mxu2 %v193_v40 }
  0x45   :  { %123 = vmatpush.xpose.msra.mxu0 %v100_v41  ;;  %272 = vmatpush.xpose.msra.mxu3 %v100_v41 }
  0x48   :  { %170 = vmatpush.xpose.msra.mxu1 %v143_v19  ;;  %217 = vmatpush.xpose.msra.mxu2 %v192_v42 }
  0x49   :  { %124 = vmatpush.xpose.msra.mxu0 %v99_v43  ;;  %273 = vmatpush.xpose.msra.mxu3 %v99_v43 }
  0x4c   :  { %171 = vmatpush.xpose.msra.mxu1 %v142_v22  ;;  %218 = vmatpush.xpose.msra.mxu2 %v191_v44 }
  0x4d   :  { %125 = vmatpush.xpose.msra.mxu0 %v98_v45  ;;  %274 = vmatpush.xpose.msra.mxu3 %v98_v45 }
  0x50   :  { %172 = vmatpush.xpose.msra.mxu1 %v141_v25  ;;  %219 = vmatpush.xpose.msra.mxu2 %v190_v46 }
  0x51   :  { %126 = vmatpush.xpose.msra.mxu0 %v97_v47  ;;  %275 = vmatpush.xpose.msra.mxu3 %v97_v47 }
  0x53   :  { %173 = vmatmul.f32.vlgmr.msra.gmra.mxu1 %v92_v28 }
  0x54   :  { %220 = vmatpush.xpose.msra.mxu2 %v189_v48 }
  0x55   :  { %127 = vmatpush.xpose.msra.mxu0 %v96_v49  ;;  %276 = vmatpush.xpose.msra.mxu3 %v96_v49 }
  0x58   :  { %128 = vmatmul.f32.vlgmr.msra.gmra.mxu0 %v92_v28  ;;  %131 = vmatmul.f32.vlgmr.msra.gmra.mxu3 %v93_v33 }
  0x5b   :  { %176 = vmatmul.f32.gmra.mxu1 %v93_v33 }
  0xd0   :  { %v174_v50 = vpop.f32.mrf.mxu1 }
  0xd1   :  { %221 = vmatmul.f32.vlgmr.msra.gmra.mxu2 %v174_v50 }
  0xd5   :  { %v129_v52 = vpop.f32.mrf.mxu0 }
  0xd8   :  { %v177_v51 = vpop.f32.mrf.mxu1 }
  0xd9   :  { %224 = vmatmul.f32.gmra.mxu2 %v177_v51 }
  0xdb   :  { %v132_v57 = vpop.f32.mrf.mxu3 }
 0x154   :  { %v222_v54 = vpop.f32.mrf.mxu2 }
 0x155   :  { %v230_v55 = vadd.f32 %v222_v54, %v129_v52 }
 0x157   :  { %v236_v56 = vadd.f32 %v284_v53, %v230_v55 }
 0x159   :  { %238 = vst [vmem:[#allocation12] sm:$0xff] %v236_v56 }
 0x15c   :  { %v225_v58 = vpop.f32.mrf.mxu2 }
 0x15d   :  { %v231_v59 = vadd.f32 %v225_v58, %v132_v57 }
 0x15f   :  { %v237_v60 = vadd.f32 %v284_v53, %v231_v59 }
 0x161   :  { %239 = vst [vmem:[#allocation12 + $0x8] sm:$0xff] %v237_v60 }
 0x162   :  { %252 = dma.vmem_to_hbm [thread:$0]  %s245_s14, 256, %s247_s17, [#allocation6], %s414_s26, %s414_s26, %s415_s27  }
 0x163   :  { %411 = dma.done.wait [#allocation6], 256  }
 0x164   :  { %412 = vsyncadd [#allocation6], 4294967040 }
 0x165   :  { %257 = vsyncpa [#allocation5], 1 }
 0x166   :  { %258 = vsyncpa [#allocation8], 1 }
 0x167   :  { %259 = vsyncpa [#allocation11], 1 }
 0x168   :  { %260 = vsyncpa [#allocation6], 1 }

</bundles_post_ra>
